<compile_context>
chip_gen: v6e
topology: v6e:2x2x1
jax: 0.10.0
libtpu: 0.0.40
codegen_flags: <defaults>
</compile_context>

<pallas_src>
import jax
import jax.numpy as jnp
from jax import lax
from jax.experimental import pallas as pl
from jax.experimental.pallas import tpu as pltpu

NEG_SLOPE = 0.01  # F.leaky_relu default negative_slope


def _leaky_relu(x):
    return jnp.where(x > 0, x, NEG_SLOPE * x)


def fcnet_kernel(x_ref, w1_ref, b1_ref, w2_ref, b2_ref, w3t_ref, b3_ref, o_ref):
    # Layer 1: (tb, in) @ (in, h) on the MXU, f32 accumulate, LeakyReLU on the VPU.
    h1 = jnp.dot(x_ref[...], w1_ref[...], preferred_element_type=jnp.float32)
    h1 = _leaky_relu(h1 + b1_ref[...])

    # Layer 2: (tb, h) @ (h, h).
    h2 = jnp.dot(h1.astype(w2_ref.dtype), w2_ref[...],
                 preferred_element_type=jnp.float32)
    h2 = _leaky_relu(h2 + b2_ref[...])

    # Layer 3, computed transposed: contract the hidden axis of w3^T (1, h)
    # with the hidden axis of h2 (tb, h) -> (1, tb).  The output block is
    # lane-dense, so the store is an unmasked full-width vst instead of a
    # 1-lane masked store.
    out_t = lax.dot_general(
        w3t_ref[...], h2.astype(w3t_ref.dtype),
        dimension_numbers=(((1,), (1,)), ((), ())),
        preferred_element_type=jnp.float32,
    )
    out_t = out_t + b3_ref[0, 0]  # scalar bias read from SMEM
    o_ref[...] = out_t.astype(o_ref.dtype)


def fcnet_forward(x, params, *, block_batch=None, compute_dtype=None,
                  vmem_limit_bytes=32 * 1024 * 1024):
    """Fused FCnet forward: x (B, input_size) -> (B, 1).

    compute_dtype: dtype of the matmul *operands* (e.g. jnp.bfloat16 on
    v6e/v7x).  Accumulation and activations are always float32.
    """
    w1, b1, w2, b2, w3, b3 = params
    B, in_size = x.shape
    hidden = w1.shape[1]
    out_dtype = x.dtype

    if compute_dtype is not None:
        x = x.astype(compute_dtype)
        w1 = w1.astype(compute_dtype)
        w2 = w2.astype(compute_dtype)
        w3 = w3.astype(compute_dtype)

    # Biases stay f32 (they are added to the f32 accumulator).
    b1 = b1.reshape(1, hidden).astype(jnp.float32)
    b2 = b2.reshape(1, hidden).astype(jnp.float32)
    b3 = b3.reshape(1, 1).astype(jnp.float32)
    # w3 is (hidden, 1); store it as a (1, hidden) row for the transposed layer 3.
    w3t = w3.reshape(1, hidden)

    # Big batch tiles amortize the ~0.35us per-grid-step overhead; for small
    # batches run a single invocation over the whole batch.
    if block_batch is None:
        block_batch = B if (B <= 2048 or B % 1024 != 0) else 1024
    assert B % block_batch == 0, "batch must be a multiple of block_batch"
    grid = (B // block_batch,)

    rep = lambda shape: pl.BlockSpec(shape, lambda i: (0, 0))  # resident weights

    out_t = pl.pallas_call(
        fcnet_kernel,
        out_shape=jax.ShapeDtypeStruct((1, B), out_dtype),
        grid_spec=pltpu.PrefetchScalarGridSpec(
            num_scalar_prefetch=0,
            grid=grid,
            in_specs=[
                pl.BlockSpec((block_batch, in_size), lambda i: (i, 0)),  # x tile
                rep((in_size, hidden)),                                  # w1
                rep((1, hidden)),                                        # b1
                rep((hidden, hidden)),                                   # w2
                rep((1, hidden)),                                        # b2
                rep((1, hidden)),                                        # w3^T row
                pl.BlockSpec(memory_space=pltpu.MemorySpace.SMEM),       # b3 scalar
            ],
            out_specs=pl.BlockSpec((1, block_batch), lambda i: (0, i)),  # lane-dense
        ),
        compiler_params=pltpu.CompilerParams(
            dimension_semantics=("parallel",),
            vmem_limit_bytes=vmem_limit_bytes,
        ),
    )(x, w1, b1, w2, b2, w3t, b3)

    return out_t.reshape(B, 1)


def init_fcnet_params(key, input_size, hidden_size, dtype=jnp.float32):
    """Deterministic init mimicking nn.Linear's U(-1/sqrt(fan_in), 1/sqrt(fan_in)).
    Weights are stored as (in, out) — i.e. already transposed vs. PyTorch."""
    ks = jax.random.split(key, 6)

    def lin(kw, kb, fan_in, fan_out):
        bound = 1.0 / jnp.sqrt(fan_in)
        w = jax.random.uniform(kw, (fan_in, fan_out), dtype, -bound, bound)
        b = jax.random.uniform(kb, (1, fan_out), dtype, -bound, bound)
        return w, b

    w1, b1 = lin(ks[0], ks[1], input_size, hidden_size)
    w2, b2 = lin(ks[2], ks[3], hidden_size, hidden_size)
    w3, b3 = lin(ks[4], ks[5], hidden_size, 1)
    return (w1, b1, w2, b2, w3, b3)


def fcnet_reference(x, params):
    w1, b1, w2, b2, w3, b3 = params
    h1 = _leaky_relu(x @ w1 + b1)
    h2 = _leaky_relu(h1 @ w2 + b2)
    return h2 @ w3 + b3


if __name__ == "__main__":
    key = jax.random.PRNGKey(0)
    k_x, k_p, k_x2 = jax.random.split(key, 3)

    input_size, hidden_size = 32, 32
    params = init_fcnet_params(k_p, input_size, hidden_size)

    # Small batch: one grid step over the whole batch (no pipeline overhead).
    x_small = jax.random.normal(k_x, (16, input_size), dtype=jnp.float32)
    out = jax.block_until_ready(fcnet_forward(x_small, params))
    ref = fcnet_reference(x_small, params)
    assert out.shape == (16, 1), out.shape
    assert jnp.allclose(out, ref, atol=1e-5, rtol=1e-4), "f32 mismatch (single tile)"

    # Larger batch: exercises the multi-step grid with MXU-aligned 128-row tiles
    # and the lane-dense (1, block_batch) output blocks.
    x_big = jax.random.normal(k_x2, (256, input_size), dtype=jnp.float32)
    out_big = jax.block_until_ready(fcnet_forward(x_big, params, block_batch=128))
    ref_big = fcnet_reference(x_big, params)
    assert out_big.shape == (256, 1), out_big.shape
    assert jnp.allclose(out_big, ref_big, atol=1e-5, rtol=1e-4), "f32 mismatch (tiled)"

    # bf16 matmul operands (v6e/v7x MXU-native path) with f32 accumulation.
    out_bf16 = jax.block_until_ready(
        fcnet_forward(x_small, params, compute_dtype=jnp.bfloat16))
    assert jnp.allclose(out_bf16, ref, atol=1e-1, rtol=1e-1), "bf16 mismatch"

    print("KERNEL_OK")
</pallas_src>

<mosaic_0001>
module attributes {stable_mosaic.version = 11 : i64} {
  func.func @fcnet_kernel(%arg0: i32, %arg1: memref<16x32xf32, #tpu.memory_space<vmem>>, %arg2: memref<32x32xf32, #tpu.memory_space<vmem>>, %arg3: memref<1x32xf32, #tpu.memory_space<vmem>>, %arg4: memref<32x32xf32, #tpu.memory_space<vmem>>, %arg5: memref<1x32xf32, #tpu.memory_space<vmem>>, %arg6: memref<1x32xf32, #tpu.memory_space<vmem>>, %arg7: memref<1x1xf32, #tpu.memory_space<smem>>, %arg8: memref<1x16xf32, #tpu.memory_space<vmem>>) attributes {dimension_semantics = [#tpu.dimension_semantics<parallel>], iteration_bounds = array<i64: 1>, scalar_prefetch = 0 : i64, scratch_operands = 0 : i64, tpu.core_type = #tpu.core_type<tc>, window_params = [{transform_indices = @transform_0, window_bounds = array<i64: 16, 32>}, {pipeline_mode = #tpu.pipeline_mode<synchronous>, transform_indices = @transform_1, window_bounds = array<i64: 32, 32>}, {pipeline_mode = #tpu.pipeline_mode<synchronous>, transform_indices = @transform_2, window_bounds = array<i64: 1, 32>}, {pipeline_mode = #tpu.pipeline_mode<synchronous>, transform_indices = @transform_3, window_bounds = array<i64: 32, 32>}, {pipeline_mode = #tpu.pipeline_mode<synchronous>, transform_indices = @transform_4, window_bounds = array<i64: 1, 32>}, {pipeline_mode = #tpu.pipeline_mode<synchronous>, transform_indices = @transform_5, window_bounds = array<i64: 1, 32>}, {transform_indices = @transform_6, window_bounds = array<i64: 1, 1>}, {transform_indices = @transform_7, window_bounds = array<i64: 1, 16>}]} {
    %c0 = arith.constant 0 : index
    %c0_0 = arith.constant 0 : index
    %0 = vector.load %arg1[%c0, %c0_0] : memref<16x32xf32, #tpu.memory_space<vmem>>, vector<16x32xf32>
    %c0_1 = arith.constant 0 : index
    %c0_2 = arith.constant 0 : index
    %1 = vector.load %arg2[%c0_1, %c0_2] : memref<32x32xf32, #tpu.memory_space<vmem>>, vector<32x32xf32>
    %cst = arith.constant dense<0.000000e+00> : vector<16x32xf32>
    %2 = tpu.matmul %0, %1, %cst {dimension_numbers = #tpu.dot_dimension_numbers<[1], [0], [0], [1], [0, 0, 1, 1], [], []>} : vector<16x32xf32>, vector<32x32xf32>, vector<16x32xf32> -> vector<16x32xf32>
    %c0_3 = arith.constant 0 : index
    %c0_4 = arith.constant 0 : index
    %3 = vector.load %arg3[%c0_3, %c0_4] : memref<1x32xf32, #tpu.memory_space<vmem>>, vector<1x32xf32>
    %4 = vector.broadcast %3 : vector<1x32xf32> to vector<16x32xf32>
    %5 = arith.addf %2, %4 : vector<16x32xf32>
    %cst_5 = arith.constant 0.000000e+00 : f32
    %6 = vector.broadcast %cst_5 : f32 to vector<16x32xf32>
    %7 = arith.cmpf ogt, %5, %6 : vector<16x32xf32>
    %cst_6 = arith.constant 0.00999999977 : f32
    %8 = vector.broadcast %cst_6 : f32 to vector<16x32xf32>
    %9 = arith.mulf %8, %5 : vector<16x32xf32>
    %10 = arith.select %7, %5, %9 : vector<16x32xi1>, vector<16x32xf32>
    %c0_7 = arith.constant 0 : index
    %c0_8 = arith.constant 0 : index
    %11 = vector.load %arg4[%c0_7, %c0_8] : memref<32x32xf32, #tpu.memory_space<vmem>>, vector<32x32xf32>
    %cst_9 = arith.constant dense<0.000000e+00> : vector<16x32xf32>
    %12 = tpu.matmul %10, %11, %cst_9 {dimension_numbers = #tpu.dot_dimension_numbers<[1], [0], [0], [1], [0, 0, 1, 1], [], []>} : vector<16x32xf32>, vector<32x32xf32>, vector<16x32xf32> -> vector<16x32xf32>
    %c0_10 = arith.constant 0 : index
    %c0_11 = arith.constant 0 : index
    %13 = vector.load %arg5[%c0_10, %c0_11] : memref<1x32xf32, #tpu.memory_space<vmem>>, vector<1x32xf32>
    %14 = vector.broadcast %13 : vector<1x32xf32> to vector<16x32xf32>
    %15 = arith.addf %12, %14 : vector<16x32xf32>
    %cst_12 = arith.constant 0.000000e+00 : f32
    %16 = vector.broadcast %cst_12 : f32 to vector<16x32xf32>
    %17 = arith.cmpf ogt, %15, %16 : vector<16x32xf32>
    %cst_13 = arith.constant 0.00999999977 : f32
    %18 = vector.broadcast %cst_13 : f32 to vector<16x32xf32>
    %19 = arith.mulf %18, %15 : vector<16x32xf32>
    %20 = arith.select %17, %15, %19 : vector<16x32xi1>, vector<16x32xf32>
    %c0_14 = arith.constant 0 : index
    %c0_15 = arith.constant 0 : index
    %21 = vector.load %arg6[%c0_14, %c0_15] : memref<1x32xf32, #tpu.memory_space<vmem>>, vector<1x32xf32>
    %cst_16 = arith.constant dense<0.000000e+00> : vector<1x16xf32>
    %22 = tpu.matmul %21, %20, %cst_16 {dimension_numbers = #tpu.dot_dimension_numbers<[1], [1], [0], [0], [0, 0, 1, 0], [], []>} : vector<1x32xf32>, vector<16x32xf32>, vector<1x16xf32> -> vector<1x16xf32>
    %c0_17 = arith.constant 0 : index
    %c0_18 = arith.constant 0 : index
    %23 = memref.load %arg7[%c0_17, %c0_18] : memref<1x1xf32, #tpu.memory_space<smem>>
    %24 = vector.broadcast %23 : f32 to vector<1x16xf32>
    %25 = arith.addf %22, %24 : vector<1x16xf32>
    %c0_19 = arith.constant 0 : index
    %c0_20 = arith.constant 0 : index
    %26 = vector.load %arg8[%c0_19, %c0_20] : memref<1x16xf32, #tpu.memory_space<vmem>>, vector<1x16xf32>
    tpu.vector_store %arg8[%c0_19, %c0_20], %25 {strides = array<i32>} : memref<1x16xf32, #tpu.memory_space<vmem>>, vector<1x16xf32>,
    return
  }
  func.func @transform_0(%arg0: i32) -> (i32, i32) {
    %c0_i32 = arith.constant 0 : i32
    %c0_i32_0 = arith.constant 0 : i32
    return %arg0, %c0_i32 : i32, i32
  }
  func.func @transform_1(%arg0: i32) -> (i32, i32) {
    %c0_i32 = arith.constant 0 : i32
    %c0_i32_0 = arith.constant 0 : i32
    %c0_i32_1 = arith.constant 0 : i32
    return %c0_i32, %c0_i32_0 : i32, i32
  }
  func.func @transform_2(%arg0: i32) -> (i32, i32) {
    %c0_i32 = arith.constant 0 : i32
    %c0_i32_0 = arith.constant 0 : i32
    %c0_i32_1 = arith.constant 0 : i32
    return %c0_i32, %c0_i32_0 : i32, i32
  }
  func.func @transform_3(%arg0: i32) -> (i32, i32) {
    %c0_i32 = arith.constant 0 : i32
    %c0_i32_0 = arith.constant 0 : i32
    %c0_i32_1 = arith.constant 0 : i32
    return %c0_i32, %c0_i32_0 : i32, i32
  }
  func.func @transform_4(%arg0: i32) -> (i32, i32) {
    %c0_i32 = arith.constant 0 : i32
    %c0_i32_0 = arith.constant 0 : i32
    %c0_i32_1 = arith.constant 0 : i32
    return %c0_i32, %c0_i32_0 : i32, i32
  }
  func.func @transform_5(%arg0: i32) -> (i32, i32) {
    %c0_i32 = arith.constant 0 : i32
    %c0_i32_0 = arith.constant 0 : i32
    %c0_i32_1 = arith.constant 0 : i32
    return %c0_i32, %c0_i32_0 : i32, i32
  }
  func.func @transform_6(%arg0: i32) -> (i32, i32) {
    %c0_i32 = arith.constant 0 : i32
    %c0_i32_0 = arith.constant 0 : i32
    %c0_i32_1 = arith.constant 0 : i32
    return %c0_i32, %c0_i32_0 : i32, i32
  }
  func.func @transform_7(%arg0: i32) -> (i32, i32) {
    %c0_i32 = arith.constant 0 : i32
    %c0_i32_0 = arith.constant 0 : i32
    return %c0_i32, %arg0 : i32, i32
  }
}

</mosaic_0001>

<bundles_post_ra>
// kernel: tpu_custom_call.1
= control target key start
LH: loop header
LB: loop body
LE: loop exit
PB: predicated region body
PF: predicated region fallthrough
CT: control target
= control target key end

     0   :  { %13 = vsyncpa [#allocation4], 0  ;;  %s594_s0 = inlined_call_operand.hbm [shape: f32[16,32], index: 0, kind: input, shape index: {}]   ;;  %s595_s1 = inlined_call_operand.hbm [shape: f32[32,32], index: 1, kind: input, shape index: {}]   ;;  %s596_s2 = inlined_call_operand.vmem [shape: f32[1,32], index: 2, kind: input, shape index: {}]   ;;  %s597_s3 = inlined_call_operand.hbm [shape: f32[32,32], index: 3, kind: input, shape index: {}]   ;;  %s598_s4 = inlined_call_operand.vmem [shape: f32[1,32], index: 4, kind: input, shape index: {}]   ;;  %s599_s5 = inlined_call_operand.vmem [shape: f32[1,32], index: 5, kind: input, shape index: {}]   ;;  %s600_s6 = inlined_call_operand.<no memory space> [shape: f32[1,1], index: 6, kind: input, shape index: {}]   ;;  %s601_s7 = inlined_call_operand.hbm [shape: f32[1,16], index: 7, kind: output, shape index: {}]  }
   0x1   :  { %14 = vsyncpa [#allocation7], 0 }
   0x2   :  { %15 = vsyncpa [#allocation5], 0  ;;  %s515_s24 = smov [#allocation6]   ;;  %s516_s26 = smov [#allocation3]  }
   0x3   :  { %s33_s25 = sshll.u32 %s515_s24, 4  ;;  %s21_s27 = sshll.u32 %s516_s26, 4  ;;  %s34_s25 = int_to_ptr.vmem [resolvable:$true] %s33_s25  ;;  %s22_s27 = int_to_ptr.vmem [resolvable:$true] %s21_s27 }
   0x4   :  { %s437_s28 = scalar_lea.vmem %s34_s25, 512  ;;  %p442_p1 = scmp.lt.s32.totalorder %s34_s25, %s34_s25 }
   0x5   :  { %p438_p0 = scmp.ne.s32.totalorder %s34_s25, %s437_s28  ;;  %p443_p2 = scmp.lt.s32.totalorder %s437_s28, %s437_s28 }
   0x7   :  { %p444_p3 = por %p443_p2, %p442_p1 }
   0x9   :  { %p445_p4 = pnand %p444_p3, %p438_p0 }
   0xb   :  { %448 = shalt.err (!%p445_p4)
}
   0xc   :  { %s517_s29 = smov 128   ;;  %s518_s30 = smov 8  }
   0xd   :  { %39 = dma.hbm_to_vmem [thread:$0]  %s595_s1, 512, %s34_s25, [#allocation7], %s517_s29, %s517_s29, %s518_s30  }
   0xe   :  { %s457_s10 = scalar_lea.vmem %s22_s27, 256  ;;  %p462_p6 = scmp.lt.s32.totalorder %s22_s27, %s22_s27 }
   0xf   :  { %p458_p5 = scmp.ne.s32.totalorder %s22_s27, %s457_s10  ;;  %p463_p7 = scmp.lt.s32.totalorder %s457_s10, %s457_s10 }
  0x11   :  { %p464_p8 = por %p463_p7, %p462_p6 }
  0x13   :  { %p465_p9 = pnand %p464_p8, %p458_p5 }
  0x15   :  { %468 = shalt.err (!%p465_p9)
}
  0x16   :  { %27 = dma.hbm_to_vmem [thread:$0]  %s594_s0, 256, %s22_s27, [#allocation4], %s517_s29, %s517_s29, %s518_s30  }
  0x17   :  { %s519_s13 = smov [#allocation8]  }
  0x18   :  { %s47_s14 = sshll.u32 %s519_s13, 4  ;;  %s48_s14 = int_to_ptr.vmem [resolvable:$true] %s47_s14 }
  0x19   :  { %s477_s15 = scalar_lea.vmem %s48_s14, 512  ;;  %p482_p11 = scmp.lt.s32.totalorder %s48_s14, %s48_s14 }
  0x1a   :  { %p478_p10 = scmp.ne.s32.totalorder %s48_s14, %s477_s15  ;;  %p483_p12 = scmp.lt.s32.totalorder %s477_s15, %s477_s15 }
  0x1c   :  { %p484_p13 = por %p483_p12, %p482_p11 }
  0x1e   :  { %p485_p0 = pnand %p484_p13, %p478_p10 }
  0x20   :  { %488 = shalt.err (!%p485_p0)
}
  0x21   :  { %53 = dma.hbm_to_vmem [thread:$0]  %s597_s3, 512, %s48_s14, [#allocation7], %s517_s29, %s517_s29, %s518_s30  }
  0x22   :  { %509 = dma.done.wait [#allocation4], 256  }
  0x23   :  { %510 = vsyncadd [#allocation4], 4294967040 }
  0x24   :  { %511 = dma.done.wait [#allocation7], 1024  }
  0x25   :  { %512 = vsyncadd [#allocation7], 4294966272  ;;  %vm82_vm0 = vcmask 261120   ;;  %v74_v0 = vld [vmem:[#allocation6 + $0x18] sm:$0xff]  ;;  %v73_v1 = vld [vmem:[#allocation6 + $0x10] sm:$0xff]  ;;  %v520_v19 = vmov 0.0   ;;  %v270_v30 = vstv %s600_s6 }
  0x26   :  { %392 = vmatprep.subr.mxu0 %v74_v0  ;;  %v69_v2 = vld [vmem:[#allocation3] sm:$0xff]  ;;  %v72_v3 = vld [vmem:[#allocation6 + $0x8] sm:$0xff]  ;;  %v71_v4 = vld [vmem:[#allocation6] sm:$0xff]  ;;  %vm521_vm3 = vmmov 0   ;;  %s522_s21 = smov [#allocation9]   ;;  %vm350_vm6 = vcmask 122880  }
  0x27   :  { %393 = vmatpush3.msra.mxu0 %v74_v0  ;;  %400 = vmatprep.mubr.msk.f32.mxu0 %vm82_vm0, %v69_v2  ;;  %v70_v5 = vld [vmem:[#allocation3 + $0x8] sm:$0xff]  ;;  %v172_v7 = vld [vmem:[#allocation8 + $0x10] sm:$0xff]  ;;  %v171_v8 = vld [vmem:[#allocation8 + $0x8] sm:$0xff]  ;;  %s358_s22 = sshll.u32 %s522_s21, 4  ;;  %s359_s22 = int_to_ptr.vmem [resolvable:$true] %s358_s22 }
  0x28   :  { %394 = vmatprep.subr.mxu0 %v73_v1  ;;  %v173_v6 = vld [vmem:[#allocation8 + $0x18] sm:$0xff]  ;;  %v170_v9 = vld [vmem:[#allocation8] sm:$0xff]  ;;  %v368_v10 = vld [vmem:[%s596_s2] ss:$0 sm:$0xff]  ;;  %s489_s23 = scalar_lea.vmem %s359_s22, 16  ;;  %s493_s24 = scalar_lea.vmem %s359_s22, 32 }
  0x29   :  { %395 = vmatpush3.msra.mxu0 %v73_v1  ;;  %403 = vmatprep.subr.mxu1 %v173_v6  ;;  %v371_v20 = vld [vmem:[%s598_s4] ss:$0 sm:$0xff]  ;;  %p490_p1 = scmp.ne.s32.totalorder %s359_s22, %s489_s23  ;;  %p494_p2 = scmp.lt.s32.totalorder %s359_s22, %s359_s22 }
  0x2a   :  { %396 = vmatprep.subr.mxu0 %v72_v3  ;;  %404 = vmatpush3.msra.mxu1 %v173_v6  ;;  %v268_v29 = vld [vmem:[%s599_s5] sm:$0x1]  ;;  %p495_p3 = scmp.lt.s32.totalorder %s493_s24, %s489_s23 }
  0x2b   :  { %397 = vmatpush3.msra.mxu0 %v72_v3  ;;  %405 = vmatprep.subr.mxu1 %v172_v7 }
  0x2c   :  { %398 = vmatprep.subr.mxu0 %v71_v4  ;;  %406 = vmatpush3.msra.mxu1 %v172_v7  ;;  %p496_p4 = por %p495_p3, %p494_p2 }
  0x2d   :  { %399 = vmatpush3.msra.mxu0 %v71_v4  ;;  %407 = vmatprep.subr.mxu1 %v171_v8 }
  0x2e   :  { %401 = vmatmul.mubr.msk.f32.vlgmr.msra.gmra.mxu0 %vm82_vm0, %v70_v5  ;;  %408 = vmatpush3.msra.mxu1 %v171_v8  ;;  %p497_p5 = pnand %p496_p4, %p490_p1 }
  0x2f   :  { %409 = vmatprep.subr.mxu1 %v170_v9  ;;  %414 = vmatprep.subr.mxu0 %v520_v19 }
  0x30   :  { %410 = vmatpush3.msra.mxu1 %v170_v9  ;;  %418 = vmatprep.mubr.msk.f32.mxu0 %vm521_vm3, %v520_v19 }
  0xee   :  { %v402_v11 = vpop.f32.mrf.mxu0 }
  0xef   :  { %v161_v12 = vadd.f32 %v402_v11, %v368_v10 }
  0xf0   :  { %v155_v13 = vpop.f32.mrf.mxu0 }
  0xf1   :  { %v156_v14 = vadd.f32 %v368_v10, %v155_v13  ;;  %v167_v15 = vmul.f32 0.01, %v161_v12  ;;  %vm165_vm1 = vcmp.gt.f32.partialorder %v161_v12, 0.0 }
  0xf3   :  { %vm164_vm2 = vcmp.gt.f32.partialorder %v156_v14, 0.0  ;;  %v166_v16 = vmul.f32 0.01, %v156_v14  ;;  %v169_v18 = vsel %vm165_vm1, %v161_v12, %v167_v15 }
  0xf5   :  { %v168_v17 = vsel %vm164_vm2, %v156_v14, %v166_v16 }
  0xf6   :  { %411 = vmatprep.mubr.msk.f32.mxu1 %vm82_vm0, %v168_v17 }
  0xf7   :  { %412 = vmatmul.mubr.msk.f32.vlgmr.msra.gmra.mxu1 %vm82_vm0, %v169_v18 }
 0x1b7   :  { %v413_v21 = vpop.f32.mrf.mxu1 }
 0x1b8   :  { %v259_v22 = vadd.f32 %v413_v21, %v371_v20 }
 0x1b9   :  { %v253_v23 = vpop.f32.mrf.mxu1 }
 0x1ba   :  { %vm263_vm4 = vcmp.gt.f32.partialorder %v259_v22, 0.0  ;;  %v265_v24 = vmul.f32 0.01, %v259_v22  ;;  %v254_v25 = vadd.f32 %v371_v20, %v253_v23 }
 0x1bc   :  { %v267_v26 = vsel %vm263_vm4, %v259_v22, %v265_v24  ;;  %v264_v27 = vmul.f32 0.01, %v254_v25  ;;  %vm262_vm5 = vcmp.gt.f32.partialorder %v254_v25, 0.0 }
 0x1bd   :  { %415 = vmatpush3.xpose.msk.msra.mxu0 %vm82_vm0, %v267_v26 }
 0x1be   :  { %416 = vmatprep.subr.mxu0 %v520_v19  ;;  %v266_v28 = vsel %vm262_vm5, %v254_v25, %v264_v27 }
 0x1c1   :  { %417 = vmatpush3.xpose.msk.msra.mxu0 %vm82_vm0, %v266_v28 }
 0x1c4   :  { %419 = vmatmul.mubr.msk.f32.vlgmr.msra.gmra.mxu0 %vm82_vm0, %v268_v29 }
 0x284   :  { %v346_v31 = vpop.f32.mrf.mxu0 }
 0x285   :  { %v347_v32 = vadd.f32 %v346_v31, %v270_v30 }
 0x286   :  { %v420_v33 = vpop.f32.mrf.mxu0 }
 0x287   :  { %351 = vst.msk [vmem:[#allocation9] sm:$0x1] %vm350_vm6, %v347_v32 }
 0x288   :  { %500 = shalt.err (!%p497_p5)
}
 0x289   :  { %361 = dma.vmem_to_hbm [thread:$0]  %s359_s22, 16, %s601_s7, [#allocation5]  }
 0x28a   :  { %513 = dma.done.wait [#allocation5], 16  }
 0x28b   :  { %514 = vsyncadd [#allocation5], 4294967280 }
 0x28c   :  { %365 = vsyncpa [#allocation4], 1 }
 0x28d   :  { %366 = vsyncpa [#allocation7], 1 }
 0x28e   :  { %367 = vsyncpa [#allocation5], 1 }

</bundles_post_ra>
